<compile_context>
chip_gen: v7x
topology: tpu7x:2x2x1
jax: 0.10.0
libtpu: 0.0.40
codegen_flags: <defaults>
</compile_context>

<pallas_src>
import jax
import jax.numpy as jnp
from jax.experimental import pallas as pl

S = 8            # seq length
D = 8            # head dim
SCALE = 4.0
DROPOUT_P = 0.7
# keep iff bits >= threshold  ->  P(keep) = 1 - p
DROP_THRESHOLD = min(int(round(DROPOUT_P * 2.0**32)), 2**32 - 1)


def attn_dropout_kernel(qkv_ref, bits_ref, o_ref):
    # qkv_ref : (3, B, S, D) f32   (stacked q, k, v -- one DMA)
    # bits_ref: (B, S, S)    u32   (dropout randomness)
    # o_ref   : (B, S, D)    f32
    q = qkv_ref[0]
    k = qkv_ref[1]
    v = qkv_ref[2]

    # qk = q @ k^T (batched), scaled by 1/4
    qk = jnp.einsum("bqd,bkd->bqk", q, k, preferred_element_type=jnp.float32)
    scaled = qk * jnp.float32(1.0 / SCALE)

    # numerically stable softmax over last dim; normalization fused with the
    # dropout keep-scale so only ONE multiply touches the full (B,S,S) tensor.
    m = jnp.max(scaled, axis=-1, keepdims=True)
    e = jnp.exp(scaled - m)
    denom = jnp.sum(e, axis=-1, keepdims=True)                   # (B, S, 1)
    inv_scale = jnp.float32(1.0 / (1.0 - DROPOUT_P)) / denom     # (B, S, 1)

    # dropout: threshold the raw uint32 bits (no shift / float convert needed)
    keep = bits_ref[...] >= jnp.uint32(DROP_THRESHOLD)
    dropped = jnp.where(keep, e * inv_scale, 0.0)

    # output = dropout(softmax(qk/4)) @ v
    o_ref[...] = jnp.einsum(
        "bqk,bkd->bqd", dropped, v, preferred_element_type=jnp.float32
    )


def model_forward(inputs, key):
    """Mirrors Model.forward: only len(inputs) matters; q/k/v are fresh randoms."""
    B = len(inputs)
    k_qkv, k_drop = jax.random.split(key)
    qkv = jax.random.normal(k_qkv, (3, B, S, D), dtype=jnp.float32)
    bits = jax.random.bits(k_drop, (B, S, S), dtype=jnp.uint32)

    # Gridless pallas_call: whole arrays as single VMEM-resident blocks
    # (total footprint ~10 KB, far below VMEM on all generations).
    out = pl.pallas_call(
        attn_dropout_kernel,
        out_shape=jax.ShapeDtypeStruct((B, S, D), jnp.float32),
    )(qkv, bits)
    return out


if __name__ == "__main__":
    key = jax.random.PRNGKey(0)
    in_key, fwd_key = jax.random.split(key)
    # Mirror `inputs = [torch.randn(1, 8, 8) for _ in range(10)]`
    inputs = [
        jax.random.normal(k, (1, S, D), dtype=jnp.float32)
        for k in jax.random.split(in_key, 10)
    ]

    out = model_forward(inputs, fwd_key)
    out = jax.block_until_ready(out)
    assert out.shape == (10, S, D), out.shape
    assert out.dtype == jnp.float32
    assert bool(jnp.all(jnp.isfinite(out)))
    print("KERNEL_OK")
</pallas_src>

<mosaic_0001>
module attributes {stable_mosaic.version = 11 : i64} {
  func.func @attn_dropout_kernel(%arg0: memref<3x10x8x8xf32, #tpu.memory_space<vmem>>, %arg1: memref<10x8x8xi32, #tpu.memory_space<vmem>>, %arg2: memref<10x8x8xf32, #tpu.memory_space<vmem>>) attributes {dimension_semantics = [], scalar_prefetch = 0 : i64, scratch_operands = 0 : i64, tpu.core_type = #tpu.core_type<tc>} {
    %c0 = arith.constant 0 : index
    %c0_0 = arith.constant 0 : index
    %c0_1 = arith.constant 0 : index
    %c0_2 = arith.constant 0 : index
    %0 = vector.load %arg0[%c0, %c0_0, %c0_1, %c0_2] : memref<3x10x8x8xf32, #tpu.memory_space<vmem>>, vector<1x10x8x8xf32>
    %1 = vector.shape_cast %0 : vector<1x10x8x8xf32> to vector<10x8x8xf32>
    %c1 = arith.constant 1 : index
    %c0_3 = arith.constant 0 : index
    %c0_4 = arith.constant 0 : index
    %c0_5 = arith.constant 0 : index
    %2 = vector.load %arg0[%c1, %c0_3, %c0_4, %c0_5] : memref<3x10x8x8xf32, #tpu.memory_space<vmem>>, vector<1x10x8x8xf32>
    %3 = vector.shape_cast %2 : vector<1x10x8x8xf32> to vector<10x8x8xf32>
    %c2 = arith.constant 2 : index
    %c0_6 = arith.constant 0 : index
    %c0_7 = arith.constant 0 : index
    %c0_8 = arith.constant 0 : index
    %4 = vector.load %arg0[%c2, %c0_6, %c0_7, %c0_8] : memref<3x10x8x8xf32, #tpu.memory_space<vmem>>, vector<1x10x8x8xf32>
    %5 = vector.shape_cast %4 : vector<1x10x8x8xf32> to vector<10x8x8xf32>
    "tpu.trace_start"() <{level = 10 : i32, message = "bqd,bkd->bqk"}> : () -> ()
    %cst = arith.constant dense<0.000000e+00> : vector<10x8x8xf32>
    %6 = tpu.matmul %1, %3, %cst {dimension_numbers = #tpu.dot_dimension_numbers<[2], [2], [1], [1], [0, 0, 0, 1, 1, 1], [0], [0]>} : vector<10x8x8xf32>, vector<10x8x8xf32>, vector<10x8x8xf32> -> vector<10x8x8xf32>
    "tpu.trace_stop"() : () -> ()
    %cst_9 = arith.constant 2.500000e-01 : f32
    %7 = vector.broadcast %cst_9 : f32 to vector<10x8x8xf32>
    %8 = arith.mulf %6, %7 : vector<10x8x8xf32>
    %cst_10 = arith.constant dense<0xFF800000> : vector<10x8xf32>
    %9 = vector.multi_reduction <maximumf>, %8, %cst_10 [2] : vector<10x8x8xf32> to vector<10x8xf32>
    %10 = vector.shape_cast %9 : vector<10x8xf32> to vector<10x8x1xf32>
    %11 = vector.broadcast %10 : vector<10x8x1xf32> to vector<10x8x8xf32>
    %12 = arith.subf %8, %11 : vector<10x8x8xf32>
    %13 = math.exp %12 : vector<10x8x8xf32>
    %cst_11 = arith.constant dense<0.000000e+00> : vector<10x8xf32>
    %14 = vector.multi_reduction <add>, %13, %cst_11 [2] : vector<10x8x8xf32> to vector<10x8xf32>
    %15 = vector.shape_cast %14 : vector<10x8xf32> to vector<10x8x1xf32>
    %cst_12 = arith.constant 3.33333325 : f32
    %16 = vector.broadcast %cst_12 : f32 to vector<10x8x1xf32>
    %17 = arith.divf %16, %15 : vector<10x8x1xf32>
    %c0_13 = arith.constant 0 : index
    %c0_14 = arith.constant 0 : index
    %c0_15 = arith.constant 0 : index
    %18 = vector.load %arg1[%c0_13, %c0_14, %c0_15] : memref<10x8x8xi32, #tpu.memory_space<vmem>>, vector<10x8x8xi32>
    %c-1288490189_i32 = arith.constant -1288490189 : i32
    %19 = vector.broadcast %c-1288490189_i32 : i32 to vector<10x8x8xi32>
    %20 = arith.cmpi uge, %18, %19 : vector<10x8x8xi32>
    %21 = vector.broadcast %17 : vector<10x8x1xf32> to vector<10x8x8xf32>
    %22 = arith.mulf %13, %21 : vector<10x8x8xf32>
    %cst_16 = arith.constant 0.000000e+00 : f32
    %23 = vector.broadcast %cst_16 : f32 to vector<10x8x8xf32>
    %24 = arith.select %20, %22, %23 : vector<10x8x8xi1>, vector<10x8x8xf32>
    "tpu.trace_start"() <{level = 10 : i32, message = "bqk,bkd->bqd"}> : () -> ()
    %cst_17 = arith.constant dense<0.000000e+00> : vector<10x8x8xf32>
    %25 = tpu.matmul %24, %5, %cst_17 {dimension_numbers = #tpu.dot_dimension_numbers<[2], [1], [1], [2], [0, 0, 0, 1, 1, 2], [0], [0]>} : vector<10x8x8xf32>, vector<10x8x8xf32>, vector<10x8x8xf32> -> vector<10x8x8xf32>
    "tpu.trace_stop"() : () -> ()
    %c0_18 = arith.constant 0 : index
    %c0_19 = arith.constant 0 : index
    %c0_20 = arith.constant 0 : index
    %26 = vector.load %arg2[%c0_18, %c0_19, %c0_20] : memref<10x8x8xf32, #tpu.memory_space<vmem>>, vector<10x8x8xf32>
    tpu.vector_store %arg2[%c0_18, %c0_19, %c0_20], %25 {strides = array<i32>} : memref<10x8x8xf32, #tpu.memory_space<vmem>>, vector<10x8x8xf32>,
    return
  }
}

</mosaic_0001>

<bundles_post_ra>
// kernel: tpu_custom_call.1
= control target key start
LH: loop header
LB: loop body
LE: loop exit
PB: predicated region body
PF: predicated region fallthrough
CT: control target
= control target key end

     0   :  { %vm43_vm0 = vcmask 64512   ;;  %v1940_v0 = vmov 0.0   ;;  %vm1941_vm1 = vmmov 0   ;;  %s2269_s0 = inlined_call_operand.vmem [shape: f32[3,10,8,8], index: 0, kind: input, shape index: {}]   ;;  %s2270_s1 = inlined_call_operand.vmem [shape: u32[10,8,8], index: 1, kind: input, shape index: {}]   ;;  %s2271_s2 = inlined_call_operand.vmem [shape: f32[10,8,8], index: 2, kind: output, shape index: {}]  }
   0x1   :  { %1798 = vmatprep.subr.mxu0 %v1940_v0  ;;  %v1708_v1 = vld [vmem:[%s2269_s0 + $0x50] sm:$0xff]  ;;  %1800 = vmatprep.mubr.msk.f32.mxu0 %vm1941_vm1, %v1940_v0  ;;  %v1709_v2 = vld [vmem:[%s2269_s0 + $0x58] sm:$0xff]  ;;  %v11_v3 = vld [vmem:[%s2269_s0] sm:$0xff] }
   0x2   :  { %1799 = vmatpush3.xpose.msk.msra.mxu0 %vm43_vm0, %v1708_v1  ;;  %1803 = vmatprep.subr.mxu1 %v1940_v0  ;;  %v1710_v4 = vld [vmem:[%s2269_s0 + $0x60] sm:$0xff]  ;;  %v12_v5 = vld [vmem:[%s2269_s0 + $0x8] sm:$0xff]  ;;  %v13_v7 = vld [vmem:[%s2269_s0 + $0x10] sm:$0xff] }
   0x3   :  { %1808 = vmatprep.subr.mxu0 %v1940_v0  ;;  %1804 = vmatpush3.xpose.msk.msra.mxu1 %vm43_vm0, %v1709_v2  ;;  %v1711_v6 = vld [vmem:[%s2269_s0 + $0x68] sm:$0xff]  ;;  %v1712_v8 = vld [vmem:[%s2269_s0 + $0x70] sm:$0xff]  ;;  %v14_v9 = vld [vmem:[%s2269_s0 + $0x18] sm:$0xff] }
   0x4   :  { %1805 = vmatprep.mubr.msk.f32.mxu1 %vm1941_vm1, %v1940_v0  ;;  %1813 = vmatprep.subr.mxu1 %v1940_v0  ;;  %v1713_v10 = vld [vmem:[%s2269_s0 + $0x78] sm:$0xff]  ;;  %v15_v11 = vld [vmem:[%s2269_s0 + $0x20] sm:$0xff]  ;;  %v16_v13 = vld [vmem:[%s2269_s0 + $0x28] sm:$0xff] }
   0x5   :  { %1801 = vmatmul.mubr.msk.f32.vlgmr.msra.gmra.mrb[0].mxu0 %vm43_vm0, %v11_v3  ;;  %v1714_v12 = vld [vmem:[%s2269_s0 + $0x80] sm:$0xff]  ;;  %v1715_v14 = vld [vmem:[%s2269_s0 + $0x88] sm:$0xff]  ;;  %v17_v15 = vld [vmem:[%s2269_s0 + $0x30] sm:$0xff] }
   0x6   :  { %1809 = vmatpush3.xpose.msk.msra.mxu0 %vm43_vm0, %v1710_v4  ;;  %1810 = vmatprep.mubr.msk.f32.mxu0 %vm1941_vm1, %v1940_v0  ;;  %v1716_v16 = vld [vmem:[%s2269_s0 + $0x90] sm:$0xff]  ;;  %v18_v17 = vld [vmem:[%s2269_s0 + $0x38] sm:$0xff]  ;;  %v19_v19 = vld [vmem:[%s2269_s0 + $0x40] sm:$0xff] }
   0x7   :  { %1806 = vmatmul.mubr.msk.f32.vlgmr.msra.gmra.mrb[0].mxu1 %vm43_vm0, %v12_v5  ;;  %1818 = vmatprep.subr.mxu0 %v1940_v0  ;;  %v1717_v18 = vld [vmem:[%s2269_s0 + $0x98] sm:$0xff]  ;;  %v20_v20 = vld [vmem:[%s2269_s0 + $0x48] sm:$0xff] }
   0x8   :  { %1814 = vmatpush3.xpose.msk.msra.mxu1 %vm43_vm0, %v1711_v6  ;;  %1815 = vmatprep.mubr.msk.f32.mxu1 %vm1941_vm1, %v1940_v0 }
   0x9   :  { %1811 = vmatmul.mubr.msk.f32.vlgmr.msra.gmra.mrb[2].mxu0 %vm43_vm0, %v13_v7  ;;  %1823 = vmatprep.subr.mxu1 %v1940_v0 }
   0xa   :  { %1819 = vmatpush3.xpose.msk.msra.mxu0 %vm43_vm0, %v1712_v8  ;;  %1820 = vmatprep.mubr.msk.f32.mxu0 %vm1941_vm1, %v1940_v0 }
   0xb   :  { %1816 = vmatmul.mubr.msk.f32.vlgmr.msra.gmra.mrb[2].mxu1 %vm43_vm0, %v14_v9  ;;  %1828 = vmatprep.subr.mxu0 %v1940_v0 }
   0xc   :  { %1824 = vmatpush3.xpose.msk.msra.mxu1 %vm43_vm0, %v1713_v10  ;;  %1825 = vmatprep.mubr.msk.f32.mxu1 %vm1941_vm1, %v1940_v0 }
   0xd   :  { %1821 = vmatmul.mubr.msk.f32.vlgmr.msra.gmra.mrb[4].mxu0 %vm43_vm0, %v15_v11  ;;  %1833 = vmatprep.subr.mxu1 %v1940_v0 }
   0xe   :  { %1829 = vmatpush3.xpose.msk.msra.mxu0 %vm43_vm0, %v1714_v12  ;;  %1830 = vmatprep.mubr.msk.f32.mxu0 %vm1941_vm1, %v1940_v0 }
   0xf   :  { %1826 = vmatmul.mubr.msk.f32.vlgmr.msra.gmra.mrb[4].mxu1 %vm43_vm0, %v16_v13  ;;  %1838 = vmatprep.subr.mxu0 %v1940_v0 }
  0x10   :  { %1834 = vmatpush3.xpose.msk.msra.mxu1 %vm43_vm0, %v1715_v14  ;;  %1835 = vmatprep.mubr.msk.f32.mxu1 %vm1941_vm1, %v1940_v0 }
  0x11   :  { %1831 = vmatmul.mubr.msk.f32.vlgmr.msra.gmra.mrb[6].mxu0 %vm43_vm0, %v17_v15  ;;  %1843 = vmatprep.subr.mxu1 %v1940_v0 }
  0x12   :  { %1839 = vmatpush3.xpose.msk.msra.mxu0 %vm43_vm0, %v1716_v16  ;;  %1840 = vmatprep.mubr.msk.f32.mxu0 %vm1941_vm1, %v1940_v0 }
  0x13   :  { %1836 = vmatmul.mubr.msk.f32.vlgmr.msra.gmra.mrb[6].mxu1 %vm43_vm0, %v18_v17  ;;  %1848 = vmatprep.subr.mxu0 %v1940_v0 }
  0x14   :  { %1844 = vmatpush3.xpose.msk.msra.mxu1 %vm43_vm0, %v1717_v18  ;;  %1845 = vmatprep.mubr.msk.f32.mxu1 %vm1941_vm1, %v1940_v0 }
  0x15   :  { %1841 = vmatmul.mubr.msk.f32.vlgmr.msra.gmra.mrb[8].mxu0 %vm43_vm0, %v19_v19  ;;  %1853 = vmatprep.subr.mxu1 %v1940_v0 }
  0x16   :  { %1850 = vmatprep.mubr.msk.f32.mxu0 %vm1941_vm1, %v1940_v0 }
  0x17   :  { %1846 = vmatmul.mubr.msk.f32.vlgmr.msra.gmra.mrb[8].mxu1 %vm43_vm0, %v20_v20 }
  0x18   :  { %1855 = vmatprep.mubr.msk.f32.mxu1 %vm1941_vm1, %v1940_v0 }
  0xd8   :  { %v116_v21 = vpop.f32.mrb[0].mxu0 }
  0xd9   :  { %v804_v22 = vmul.f32 0.25, %v116_v21  ;;  %v1802_v23 = vpop.f32.mrb[1].mxu0 }
  0xda   :  { %v192_v24 = vpop.f32.mrb[0].mxu1 }
  0xdb   :  { %v805_v25 = vmul.f32 0.25, %v192_v24  ;;  %v814_v26 = vsel %vm43_vm0, %v804_v22, -inf  ;;  %v1807_v27 = vpop.f32.mrb[1].mxu1 }
  0xdc   :  { %815 = vmax.xlane.f32.xlu0 %v814_v26  ;;  %v268_v28 = vpop.f32.mrb[2].mxu0 }
  0xdd   :  { %v806_v29 = vmul.f32 0.25, %v268_v28  ;;  %v1812_v30 = vpop.f32.mrb[3].mxu0  ;;  %v817_v31 = vsel %vm43_vm0, %v805_v25, -inf }
  0xde   :  { %v344_v32 = vpop.f32.mrb[2].mxu1 }
  0xdf   :  { %v807_v33 = vmul.f32 0.25, %v344_v32  ;;  %v820_v34 = vsel %vm43_vm0, %v806_v29, -inf  ;;  %v1817_v35 = vpop.f32.mrb[3].mxu1 }
  0xe0   :  { %818 = vmax.xlane.f32.xlu0 %v817_v31  ;;  %821 = vmax.xlane.f32.xlu1 %v820_v34  ;;  %v420_v36 = vpop.f32.mrb[4].mxu0 }
  0xe1   :  { %v808_v37 = vmul.f32 0.25, %v420_v36  ;;  %v1822_v38 = vpop.f32.mrb[5].mxu0  ;;  %v823_v39 = vsel %vm43_vm0, %v807_v33, -inf }
  0xe2   :  { %v496_v40 = vpop.f32.mrb[4].mxu1 }
  0xe3   :  { %v809_v41 = vmul.f32 0.25, %v496_v40  ;;  %v826_v42 = vsel %vm43_vm0, %v808_v37, -inf  ;;  %v1827_v43 = vpop.f32.mrb[5].mxu1 }
  0xe4   :  { %824 = vmax.xlane.f32.xlu1 %v823_v39  ;;  %827 = vmax.xlane.f32.xlu0 %v826_v42  ;;  %v572_v44 = vpop.f32.mrb[6].mxu0 }
  0xe5   :  { %v810_v45 = vmul.f32 0.25, %v572_v44  ;;  %v1832_v46 = vpop.f32.mrb[7].mxu0  ;;  %v829_v47 = vsel %vm43_vm0, %v809_v41, -inf }
  0xe6   :  { %v648_v48 = vpop.f32.mrb[6].mxu1 }
  0xe7   :  { %v811_v49 = vmul.f32 0.25, %v648_v48  ;;  %v832_v50 = vsel %vm43_vm0, %v810_v45, -inf  ;;  %v1837_v51 = vpop.f32.mrb[7].mxu1  ;;  %v1718_v48 = vld [vmem:[%s2269_s0 + $0xa0] sm:$0xff] }
  0xe8   :  { %830 = vmax.xlane.f32.xlu1 %v829_v47  ;;  %833 = vmax.xlane.f32.xlu0 %v832_v50  ;;  %v724_v52 = vpop.f32.mrb[8].mxu0 }
  0xe9   :  { %v812_v53 = vmul.f32 0.25, %v724_v52  ;;  %v835_v54 = vsel %vm43_vm0, %v811_v49, -inf  ;;  %v1842_v55 = vpop.f32.mrb[9].mxu0  ;;  %1849 = vmatpush3.msra.mxu0 %v1718_v48 }
  0xea   :  { %v800_v56 = vpop.f32.mrb[8].mxu1  ;;  %1858 = vmatprep.subr.mxu0 %v1940_v0  ;;  %v924_v55 = vld [vmem:[%s2270_s1] sm:$0xff] }
  0xeb   :  { %v813_v57 = vmul.f32 0.25, %v800_v56  ;;  %v838_v58 = vsel %vm43_vm0, %v812_v53, -inf  ;;  %v1847_v59 = vpop.f32.mrb[9].mxu1  ;;  %vm934_vm2 = vcmp.ge.u32.totalorder %v924_v55, 3006477107 }
  0xec   :  { %836 = vmax.xlane.f32.xlu1 %v835_v54  ;;  %839 = vmax.xlane.f32.xlu0 %v838_v58 }
  0xed   :  { %v841_v60 = vsel %vm43_vm0, %v813_v57, -inf }
  0xf0   :  { %842 = vmax.xlane.f32.xlu1 %v841_v60 }
 0x169   :  { %v816_v61 = vpop.xlane.xlu0 %815 }
 0x16a   :  { %v844_v62 = vsub.f32 %v804_v22, %v816_v61  ;;  %v925_v61 = vld [vmem:[%s2270_s1 + $0x8] sm:$0xff] }
 0x16b   :  { %vm935_vm3 = vcmp.ge.u32.totalorder %v925_v61, 3006477107 }
 0x16c   :  { %v854_v63 = vmul.f32 1.442695, %v844_v62 }
 0x16d   :  { %v819_v1 = vpop.xlane.xlu0 %818  ;;  %v822_v2 = vpop.xlane.xlu1 %821 }
 0x16e   :  { %1900 = vpow2.f32 %v854_v63  ;;  %v845_v3 = vsub.f32 %v805_v25, %v819_v1  ;;  %v846_v4 = vsub.f32 %v806_v29, %v822_v2  ;;  %v1720_v63 = vld [vmem:[%s2269_s0 + $0xb0] sm:$0xff] }
 0x16f   :  { %v926_v1 = vld [vmem:[%s2270_s1 + $0x10] sm:$0xff] }
 0x170   :  { %v856_v5 = vmul.f32 1.442695, %v845_v3  ;;  %v858_v6 = vmul.f32 1.442695, %v846_v4  ;;  %vm936_vm4 = vcmp.ge.u32.totalorder %v926_v1, 3006477107 }
 0x171   :  { %v825_v7 = vpop.xlane.xlu1 %824  ;;  %v828_v8 = vpop.xlane.xlu0 %827 }
 0x172   :  { %1902 = vpow2.f32 %v856_v5  ;;  %v847_v9 = vsub.f32 %v807_v33, %v825_v7  ;;  %v848_v10 = vsub.f32 %v808_v37, %v828_v8 }
 0x173   :  { %1904 = vpow2.f32 %v858_v6 }
 0x174   :  { %v860_v11 = vmul.f32 1.442695, %v847_v9  ;;  %v862_v12 = vmul.f32 1.442695, %v848_v10  ;;  %v927_v9 = vld [vmem:[%s2270_s1 + $0x18] sm:$0xff] }
 0x175   :  { %v831_v13 = vpop.xlane.xlu1 %830  ;;  %v834_v14 = vpop.xlane.xlu0 %833  ;;  %vm937_vm5 = vcmp.ge.u32.totalorder %v927_v9, 3006477107 }
 0x176   :  { %1906 = vpow2.f32 %v860_v11  ;;  %v849_v15 = vsub.f32 %v809_v41, %v831_v13  ;;  %v850_v16 = vsub.f32 %v810_v45, %v834_v14  ;;  %v928_v13 = vld [vmem:[%s2270_s1 + $0x20] sm:$0xff] }
 0x177   :  { %1908 = vpow2.f32 %v862_v12  ;;  %v1721_v12 = vld [vmem:[%s2269_s0 + $0xb8] sm:$0xff]  ;;  %vm938_vm6 = vcmp.ge.u32.totalorder %v928_v13, 3006477107 }
 0x178   :  { %v2083_v17 = vpop.eup %1900  ;;  %v864_v18 = vmul.f32 1.442695, %v849_v15  ;;  %v866_v19 = vmul.f32 1.442695, %v850_v16 }
 0x179   :  { %v837_v20 = vpop.xlane.xlu1 %836  ;;  %v840_v21 = vpop.xlane.xlu0 %839  ;;  %v874_v22 = vsel %vm43_vm0, %v2083_v17, 0.0 }
 0x17a   :  { %1910 = vpow2.f32 %v864_v18  ;;  %v851_v23 = vsub.f32 %v811_v49, %v837_v20  ;;  %v852_v24 = vsub.f32 %v812_v53, %v840_v21  ;;  %875 = vadd.xlane.f32.xlu0 %v874_v22  ;;  %v1719_v49 = vld [vmem:[%s2269_s0 + $0xa8] sm:$0xff]  ;;  %v1722_v18 = vld [vmem:[%s2269_s0 + $0xc0] sm:$0xff] }
 0x17b   :  { %1912 = vpow2.f32 %v866_v19  ;;  %1854 = vmatpush3.msra.mxu1 %v1719_v49  ;;  %v929_v22 = vld [vmem:[%s2270_s1 + $0x28] sm:$0xff] }
 0x17c   :  { %v2087_v25 = vpop.eup %1902  ;;  %v868_v26 = vmul.f32 1.442695, %v851_v23  ;;  %v870_v27 = vmul.f32 1.442695, %v852_v24  ;;  %1863 = vmatprep.subr.mxu1 %v1940_v0  ;;  %vm939_vm7 = vcmp.ge.u32.totalorder %v929_v22, 3006477107 }
 0x17d   :  { %v2089_v28 = vpop.eup %1904  ;;  %v843_v29 = vpop.xlane.xlu1 %842  ;;  %v877_v30 = vsel %vm43_vm0, %v2087_v25, 0.0  ;;  %v933_v49 = vld [vmem:[%s2270_s1 + $0x48] sm:$0xff] }
 0x17e   :  { %1914 = vpow2.f32 %v868_v26  ;;  %v853_v31 = vsub.f32 %v813_v57, %v843_v29  ;;  %878 = vadd.xlane.f32.xlu1 %v877_v30  ;;  %v880_v32 = vsel %vm43_vm0, %v2089_v28, 0.0  ;;  %v930_v26 = vld [vmem:[%s2270_s1 + $0x30] sm:$0xff]  ;;  %vm943_vm11 = vcmp.ge.u32.totalorder %v933_v49, 3006477107 }
 0x17f   :  { %1916 = vpow2.f32 %v870_v27  ;;  %881 = vadd.xlane.f32.xlu0 %v880_v32  ;;  %v1724_v30 = vld [vmem:[%s2269_s0 + $0xd0] sm:$0xff]  ;;  %vm940_vm8 = vcmp.ge.u32.totalorder %v930_v26, 3006477107 }
 0x180   :  { %v2095_v33 = vpop.eup %1906  ;;  %v872_v34 = vmul.f32 1.442695, %v853_v31 }
 0x181   :  { %v2097_v35 = vpop.eup %1908  ;;  %v883_v36 = vsel %vm43_vm0, %v2095_v33, 0.0 }
 0x182   :  { %1918 = vpow2.f32 %v872_v34  ;;  %884 = vadd.xlane.f32.xlu1 %v883_v36  ;;  %v886_v37 = vsel %vm43_vm0, %v2097_v35, 0.0  ;;  %v931_v34 = vld [vmem:[%s2270_s1 + $0x38] sm:$0xff] }
 0x183   :  { %887 = vadd.xlane.f32.xlu0 %v886_v37  ;;  %v1725_v37 = vld [vmem:[%s2269_s0 + $0xd8] sm:$0xff]  ;;  %vm941_vm9 = vcmp.ge.u32.totalorder %v931_v34, 3006477107 }
 0x184   :  { %v2103_v38 = vpop.eup %1910 }
 0x185   :  { %v2105_v39 = vpop.eup %1912  ;;  %v889_v40 = vsel %vm43_vm0, %v2103_v38, 0.0 }
 0x186   :  { %890 = vadd.xlane.f32.xlu1 %v889_v40  ;;  %v892_v41 = vsel %vm43_vm0, %v2105_v39, 0.0 }
 0x187   :  { %893 = vadd.xlane.f32.xlu0 %v892_v41 }
 0x188   :  { %v2111_v42 = vpop.eup %1914 }
 0x189   :  { %v2113_v43 = vpop.eup %1916  ;;  %v895_v44 = vsel %vm43_vm0, %v2111_v42, 0.0 }
 0x18a   :  { %896 = vadd.xlane.f32.xlu1 %v895_v44  ;;  %v898_v45 = vsel %vm43_vm0, %v2113_v43, 0.0 }
 0x18b   :  { %899 = vadd.xlane.f32.xlu0 %v898_v45 }
 0x18c   :  { %v2119_v46 = vpop.eup %1918 }
 0x18d   :  { %v901_v47 = vsel %vm43_vm0, %v2119_v46, 0.0 }
 0x18e   :  { %902 = vadd.xlane.f32.xlu1 %v901_v47 }
 0x207   :  { %v876_v50 = vpop.xlane.xlu0 %875 }
 0x208   :  { %1920 = vrcp.f32 %v876_v50 }
 0x20b   :  { %v879_v51 = vpop.xlane.xlu1 %878 }
 0x20c   :  { %1922 = vrcp.f32 %v879_v51  ;;  %v882_v52 = vpop.xlane.xlu0 %881 }
 0x20d   :  { %1924 = vrcp.f32 %v882_v52  ;;  %v1727_v52 = vld [vmem:[%s2269_s0 + $0xe8] sm:$0xff] }
 0x20f   :  { %v885_v53 = vpop.xlane.xlu1 %884 }
 0x210   :  { %1926 = vrcp.f32 %v885_v53  ;;  %v888_v54 = vpop.xlane.xlu0 %887 }
 0x211   :  { %1928 = vrcp.f32 %v888_v54 }
 0x212   :  { %v1921_v56 = vpop.eup %1920 }
 0x213   :  { %v905_v57 = vmul.f32 3.3333333, %v1921_v56  ;;  %v891_v58 = vpop.xlane.xlu1 %890 }
 0x214   :  { %1930 = vrcp.f32 %v891_v58  ;;  %v894_v59 = vpop.xlane.xlu0 %893 }
 0x215   :  { %v944_v60 = vmul.f32 %v2083_v17, %v905_v57  ;;  %1932 = vrcp.f32 %v894_v59 }
 0x216   :  { %v1923_v62 = vpop.eup %1922 }
 0x217   :  { %v1925_v2 = vpop.eup %1924  ;;  %v907_v3 = vmul.f32 3.3333333, %v1923_v62  ;;  %v897_v4 = vpop.xlane.xlu1 %896  ;;  %v954_v5 = vsel %vm934_vm2, %v944_v60, 0.0 }
 0x218   :  { %v909_v6 = vmul.f32 3.3333333, %v1925_v2  ;;  %1934 = vrcp.f32 %v897_v4  ;;  %v900_v7 = vpop.xlane.xlu0 %899  ;;  %1851 = vmatmul.mubr.msk.f32.vlgmr.msra.gmra.mrb[10].mxu0 %vm43_vm0, %v954_v5 }
 0x219   :  { %v945_v8 = vmul.f32 %v2087_v25, %v907_v3  ;;  %1936 = vrcp.f32 %v900_v7  ;;  %1859 = vmatpush3.msra.mxu0 %v1720_v63  ;;  %1860 = vmatprep.mubr.msk.f32.mxu0 %vm1941_vm1, %v1940_v0  ;;  %v1723_v25 = vld [vmem:[%s2269_s0 + $0xc8] sm:$0xff] }
 0x21a   :  { %v1927_v10 = vpop.eup %1926  ;;  %v946_v11 = vmul.f32 %v2089_v28, %v909_v6  ;;  %1868 = vmatprep.subr.mxu0 %v1940_v0 }
 0x21b   :  { %v1929_v14 = vpop.eup %1928  ;;  %v911_v15 = vmul.f32 3.3333333, %v1927_v10  ;;  %v903_v16 = vpop.xlane.xlu1 %902  ;;  %v955_v17 = vsel %vm935_vm3, %v945_v8, 0.0 }
 0x21c   :  { %v913_v19 = vmul.f32 3.3333333, %v1929_v14  ;;  %1938 = vrcp.f32 %v903_v16  ;;  %1856 = vmatmul.mubr.msk.f32.vlgmr.msra.gmra.mrb[10].mxu1 %vm43_vm0, %v955_v17  ;;  %v956_v20 = vsel %vm936_vm4, %v946_v11, 0.0 }
 0x21d   :  { %v947_v21 = vmul.f32 %v2095_v33, %v911_v15  ;;  %1861 = vmatmul.mubr.msk.f32.vlgmr.msra.gmra.mrb[12].mxu0 %vm43_vm0, %v956_v20  ;;  %1864 = vmatpush3.msra.mxu1 %v1721_v12 }
 0x21e   :  { %v1931_v23 = vpop.eup %1930  ;;  %v948_v24 = vmul.f32 %v2097_v35, %v913_v19  ;;  %1865 = vmatprep.mubr.msk.f32.mxu1 %vm1941_vm1, %v1940_v0  ;;  %1869 = vmatpush3.msra.mxu0 %v1722_v18 }
 0x21f   :  { %v1933_v27 = vpop.eup %1932  ;;  %v915_v28 = vmul.f32 3.3333333, %v1931_v23  ;;  %1870 = vmatprep.mubr.msk.f32.mxu0 %vm1941_vm1, %v1940_v0  ;;  %v957_v29 = vsel %vm937_vm5, %v947_v21, 0.0  ;;  %1873 = vmatprep.subr.mxu1 %v1940_v0 }
 0x220   :  { %v917_v31 = vmul.f32 3.3333333, %v1933_v27  ;;  %1866 = vmatmul.mubr.msk.f32.vlgmr.msra.gmra.mrb[12].mxu1 %vm43_vm0, %v957_v29  ;;  %v958_v32 = vsel %vm938_vm6, %v948_v24, 0.0  ;;  %1878 = vmatprep.subr.mxu0 %v1940_v0 }
 0x221   :  { %v949_v33 = vmul.f32 %v2103_v38, %v915_v28  ;;  %1871 = vmatmul.mubr.msk.f32.vlgmr.msra.gmra.mrb[14].mxu0 %vm43_vm0, %v958_v32  ;;  %1874 = vmatpush3.msra.mxu1 %v1723_v25  ;;  %v932_v38 = vld [vmem:[%s2270_s1 + $0x40] sm:$0xff] }
 0x222   :  { %v1935_v35 = vpop.eup %1934  ;;  %v950_v36 = vmul.f32 %v2105_v39, %v917_v31  ;;  %1875 = vmatprep.mubr.msk.f32.mxu1 %vm1941_vm1, %v1940_v0  ;;  %1879 = vmatpush3.msra.mxu0 %v1724_v30  ;;  %v1726_v39 = vld [vmem:[%s2269_s0 + $0xe0] sm:$0xff]  ;;  %vm942_vm10 = vcmp.ge.u32.totalorder %v932_v38, 3006477107 }
 0x223   :  { %v1937_v40 = vpop.eup %1936  ;;  %v919_v41 = vmul.f32 3.3333333, %v1935_v35  ;;  %1880 = vmatprep.mubr.msk.f32.mxu0 %vm1941_vm1, %v1940_v0  ;;  %v959_v44 = vsel %vm939_vm7, %v949_v33, 0.0  ;;  %1883 = vmatprep.subr.mxu1 %v1940_v0 }
 0x224   :  { %v921_v45 = vmul.f32 3.3333333, %v1937_v40  ;;  %1876 = vmatmul.mubr.msk.f32.vlgmr.msra.gmra.mrb[14].mxu1 %vm43_vm0, %v959_v44  ;;  %v960_v47 = vsel %vm940_vm8, %v950_v36, 0.0  ;;  %1888 = vmatprep.subr.mxu0 %v1940_v0 }
 0x225   :  { %v951_v48 = vmul.f32 %v2111_v42, %v919_v41  ;;  %1881 = vmatmul.mubr.msk.f32.vlgmr.msra.gmra.mrb[16].mxu0 %vm43_vm0, %v960_v47  ;;  %1884 = vmatpush3.msra.mxu1 %v1725_v37 }
 0x226   :  { %v1939_v50 = vpop.eup %1938  ;;  %v952_v51 = vmul.f32 %v2113_v43, %v921_v45  ;;  %1885 = vmatprep.mubr.msk.f32.mxu1 %vm1941_vm1, %v1940_v0  ;;  %1889 = vmatpush3.msra.mxu0 %v1726_v39 }
 0x227   :  { %v923_v42 = vmul.f32 3.3333333, %v1939_v50  ;;  %1890 = vmatprep.mubr.msk.f32.mxu0 %vm1941_vm1, %v1940_v0  ;;  %v961_v53 = vsel %vm941_vm9, %v951_v48, 0.0  ;;  %1893 = vmatprep.subr.mxu1 %v1940_v0 }
 0x228   :  { %1886 = vmatmul.mubr.msk.f32.vlgmr.msra.gmra.mrb[16].mxu1 %vm43_vm0, %v961_v53  ;;  %v962_v54 = vsel %vm942_vm10, %v952_v51, 0.0 }
 0x229   :  { %v953_v43 = vmul.f32 %v2119_v46, %v923_v42  ;;  %1891 = vmatmul.mubr.msk.f32.vlgmr.msra.gmra.mrb[18].mxu0 %vm43_vm0, %v962_v54  ;;  %1894 = vmatpush3.msra.mxu1 %v1727_v52 }
 0x22a   :  { %1895 = vmatprep.mubr.msk.f32.mxu1 %vm1941_vm1, %v1940_v0 }
 0x22b   :  { %v963_v55 = vsel %vm943_vm11, %v953_v43, 0.0 }
 0x22c   :  { %1896 = vmatmul.mubr.msk.f32.vlgmr.msra.gmra.mrb[18].mxu1 %vm43_vm0, %v963_v55 }
 0x2eb   :  { %v1033_v56 = vpop.f32.mrb[10].mxu0 }
 0x2ec   :  { %1694 = vst.msk [vmem:[%s2271_s2] sm:$0xff] %vm43_vm0, %v1033_v56  ;;  %v1852_v57 = vpop.f32.mrb[11].mxu0 }
 0x2ef   :  { %v1106_v58 = vpop.f32.mrb[10].mxu1 }
 0x2f0   :  { %1695 = vst.msk [vmem:[%s2271_s2 + $0x8] sm:$0xff] %vm43_vm0, %v1106_v58  ;;  %v1179_v46 = vpop.f32.mrb[12].mxu0  ;;  %v1857_v59 = vpop.f32.mrb[11].mxu1 }
 0x2f1   :  { %1696 = vst.msk [vmem:[%s2271_s2 + $0x10] sm:$0xff] %vm43_vm0, %v1179_v46  ;;  %v1862_v0 = vpop.f32.mrb[13].mxu0 }
 0x2f3   :  { %v1252_v60 = vpop.f32.mrb[12].mxu1 }
 0x2f4   :  { %1697 = vst.msk [vmem:[%s2271_s2 + $0x18] sm:$0xff] %vm43_vm0, %v1252_v60  ;;  %v1325_v61 = vpop.f32.mrb[14].mxu0  ;;  %v1867_v62 = vpop.f32.mrb[13].mxu1 }
 0x2f5   :  { %1698 = vst.msk [vmem:[%s2271_s2 + $0x20] sm:$0xff] %vm43_vm0, %v1325_v61  ;;  %v1872_v63 = vpop.f32.mrb[15].mxu0 }
 0x2f7   :  { %v1398_v1 = vpop.f32.mrb[14].mxu1 }
 0x2f8   :  { %1699 = vst.msk [vmem:[%s2271_s2 + $0x28] sm:$0xff] %vm43_vm0, %v1398_v1  ;;  %v1471_v2 = vpop.f32.mrb[16].mxu0  ;;  %v1877_v3 = vpop.f32.mrb[15].mxu1 }
 0x2f9   :  { %1700 = vst.msk [vmem:[%s2271_s2 + $0x30] sm:$0xff] %vm43_vm0, %v1471_v2  ;;  %v1882_v4 = vpop.f32.mrb[17].mxu0 }
 0x2fb   :  { %v1544_v5 = vpop.f32.mrb[16].mxu1 }
 0x2fc   :  { %1701 = vst.msk [vmem:[%s2271_s2 + $0x38] sm:$0xff] %vm43_vm0, %v1544_v5  ;;  %v1617_v6 = vpop.f32.mrb[18].mxu0  ;;  %v1887_v7 = vpop.f32.mrb[17].mxu1 }
 0x2fd   :  { %1702 = vst.msk [vmem:[%s2271_s2 + $0x40] sm:$0xff] %vm43_vm0, %v1617_v6  ;;  %v1892_v8 = vpop.f32.mrb[19].mxu0 }
 0x2ff   :  { %v1690_v9 = vpop.f32.mrb[18].mxu1 }
 0x300   :  { %1703 = vst.msk [vmem:[%s2271_s2 + $0x48] sm:$0xff] %vm43_vm0, %v1690_v9  ;;  %v1897_v10 = vpop.f32.mrb[19].mxu1 }

</bundles_post_ra>
